<compile_context>
chip_gen: v7x
topology: tpu7x:2x2x1
jax: 0.10.0
libtpu: 0.0.40
codegen_flags: <defaults>
</compile_context>

<pallas_src>
import functools

import jax
import jax.numpy as jnp
from jax import lax
from jax.experimental import pallas as pl
from jax.experimental.pallas import tpu as pltpu


_LANE = 128            # lane width (last dim)
_SUBLANE = 16          # row-block granularity (covers bf16 packing too)
_ACC_ROWS = 8          # accumulator height (one f32 vreg: (8,128))
_MAX_ROW_BLOCK = 2048  # 2048*128 f32 = 1 MiB per operand per grid step
_VMEM_LIMIT = 32 * 1024 * 1024


def _round_up(x, m):
    return ((x + m - 1) // m) * m


def _pick_tb(rows):
    """Rows per grid step: single full block for small inputs, otherwise a
    multiple-of-16 block aiming for ~8 blocks, capped at 1 MiB per operand."""
    if rows <= 1024:
        return int(rows)
    tb = _round_up(pl.cdiv(rows, 8), _SUBLANE)
    return int(max(512, min(_MAX_ROW_BLOCK, tb)))


def _focal_elements(x, t, alpha, gamma):
    """Per-element binary focal loss with logits (f32, VPU/EUP only)."""
    # Numerically stable BCE-with-logits: max(x,0) - x*t + log(1 + exp(-|x|)).
    bce = jnp.maximum(x, 0.0) - x * t + jnp.log(1.0 + jnp.exp(-jnp.abs(x)))
    pt = jnp.exp(-bce)
    # alpha_table = [alpha, 1-alpha]; gather(0, targets.long()) == 2-way select
    # (torch truncates targets to long before the gather).
    at = jnp.where(t.astype(jnp.int32) == 0, alpha, 1.0 - alpha)
    omp = 1.0 - pt
    g = float(gamma)
    if g == 0.0:
        mod = jnp.ones_like(omp)
    elif g == round(g) and 1.0 <= g <= 8.0:
        mod = omp
        for _ in range(int(round(g)) - 1):
            mod = mod * omp                       # VPU multiplies, no EUP pow
    else:
        # Generic gamma via exp/log on the EUP; the clamp keeps log finite at
        # omp == 0 (there bce == 0, so the product is 0 either way).
        mod = jnp.exp(g * jnp.log(jnp.maximum(omp, 1e-37)))
    return at * mod * bce


def _accumulate(acc_ref, f):
    """acc (8,128) += row-group sum of f (tb,128) using plain VPU adds."""
    tb = f.shape[0]
    if tb % _ACC_ROWS == 0:
        acc_ref[...] += jnp.sum(f.reshape(-1, _ACC_ROWS, _LANE), axis=0)
    else:
        # Tiny single-block case (tb not a multiple of 8): fold into row 0.
        s = jnp.sum(f, axis=0, keepdims=True)                    # (1, LANE)
        first = lax.broadcasted_iota(jnp.int32, (_ACC_ROWS, _LANE), 0) == 0
        acc_ref[...] += jnp.where(first, s, 0.0)


def _focal_reduce_kernel(alpha, gamma, nblocks, n_valid, inv_divisor, ragged,
                         x_ref, t_ref, out_ref, acc_ref):
    c = pl.program_id(0)          # core-split axis (size 2, "parallel")
    j = pl.program_id(1)          # blocks per core ("arbitrary")
    bpc = pl.num_programs(1)
    gblk = c * bpc + j            # global block index (clamped in index_map)

    @pl.when(j == 0)
    def _():
        acc_ref[...] = jnp.zeros_like(acc_ref)

    n_full = nblocks - 1 if ragged else nblocks

    # Hot path: full blocks, no masking, no iotas.
    @pl.when(gblk < n_full)
    def _():
        f = _focal_elements(x_ref[...].astype(jnp.float32),
                            t_ref[...].astype(jnp.float32), alpha, gamma)
        _accumulate(acc_ref, f)

    if ragged:
        # Only the single trailing ragged block pays for the padding mask.
        @pl.when(gblk == nblocks - 1)
        def _():
            f = _focal_elements(x_ref[...].astype(jnp.float32),
                                t_ref[...].astype(jnp.float32), alpha, gamma)
            tb = x_ref.shape[0]
            row = lax.broadcasted_iota(jnp.int32, (tb, _LANE), 0)
            col = lax.broadcasted_iota(jnp.int32, (tb, _LANE), 1)
            flat = (nblocks - 1) * tb * _LANE + row * _LANE + col
            f = jnp.where(flat < n_valid, f, 0.0)
            _accumulate(acc_ref, f)

    @pl.when(j == bpc - 1)
    def _():
        out_ref[...] = acc_ref[...] * inv_divisor


def _focal_elementwise_kernel(alpha, gamma, x_ref, t_ref, out_ref):
    out_ref[...] = _focal_elements(x_ref[...].astype(jnp.float32),
                                   t_ref[...].astype(jnp.float32),
                                   alpha, gamma)


def _prep_operand(a):
    """Flatten; keep f32/bf16 native (upcast happens in-kernel)."""
    if a.dtype not in (jnp.float32, jnp.bfloat16):
        a = a.astype(jnp.float32)
    return jnp.ravel(a)


def focal_loss(inputs, targets, *, alpha=0.5, gamma=1.0, reduction="mean"):
    """Pallas TPU focal loss. inputs/targets: same shape, targets in {0, 1}."""
    orig_shape = inputs.shape
    x = _prep_operand(inputs)
    t = _prep_operand(targets)
    n = int(x.shape[0])

    rows = pl.cdiv(n, _LANE)
    pad_elems = rows * _LANE - n
    if pad_elems:                      # only copy when the tail is ragged
        x = jnp.pad(x, (0, pad_elems))
        t = jnp.pad(t, (0, pad_elems))
    x2 = x.reshape(rows, _LANE)        # free for contiguous inputs
    t2 = t.reshape(rows, _LANE)

    tb = _pick_tb(rows)
    nblocks = int(pl.cdiv(rows, tb))
    ragged = (nblocks * tb * _LANE != n)

    if reduction in ("mean", "sum"):
        inv = (1.0 / n) if reduction == "mean" else 1.0
        bpc = int(pl.cdiv(nblocks, 2))     # blocks per core (v7x megacore split)
        kernel = functools.partial(_focal_reduce_kernel, float(alpha),
                                   float(gamma), nblocks, n, float(inv),
                                   bool(ragged))
        in_blk = pl.BlockSpec(
            (tb, _LANE),
            lambda c, j: (jnp.minimum(c * bpc + j, nblocks - 1), 0))
        partials = pl.pallas_call(
            kernel,
            out_shape=jax.ShapeDtypeStruct((2 * _ACC_ROWS, _LANE), jnp.float32),
            grid=(2, bpc),
            in_specs=[in_blk, in_blk],
            out_specs=pl.BlockSpec((_ACC_ROWS, _LANE), lambda c, j: (c, 0)),
            scratch_shapes=[pltpu.VMEM((_ACC_ROWS, _LANE), jnp.float32)],
            compiler_params=pltpu.CompilerParams(
                dimension_semantics=("parallel", "arbitrary"),
                vmem_limit_bytes=_VMEM_LIMIT),
        )(x2, t2)
        # Tiny final reduce of the per-core (8,128) partials in plain XLA.
        return jnp.sum(partials)

    if reduction == "none":
        kernel = functools.partial(_focal_elementwise_kernel, float(alpha),
                                   float(gamma))
        blk = pl.BlockSpec((tb, _LANE), lambda i: (i, 0))
        out = pl.pallas_call(
            kernel,
            out_shape=jax.ShapeDtypeStruct((rows, _LANE), jnp.float32),
            grid=(nblocks,),
            in_specs=[blk, blk],
            out_specs=blk,
            compiler_params=pltpu.CompilerParams(
                dimension_semantics=("parallel",),
                vmem_limit_bytes=_VMEM_LIMIT),
        )(x2, t2)
        if pad_elems:
            return out.reshape(-1)[:n].reshape(orig_shape)
        return out.reshape(orig_shape)

    raise ValueError(f"unknown reduction: {reduction!r}")


def focal_loss_reference(inputs, targets, *, alpha=0.5, gamma=1.0,
                         reduction="mean"):
    """Pure-JAX reference mirroring the PyTorch module."""
    x = inputs.astype(jnp.float32)
    t = targets.astype(jnp.float32)
    bce = jnp.maximum(x, 0.0) - x * t + jnp.log(1.0 + jnp.exp(-jnp.abs(x)))
    pt = jnp.exp(-bce)
    at = jnp.where(t.astype(jnp.int32) == 0, alpha, 1.0 - alpha)
    f = at * (1.0 - pt) ** gamma * bce
    if reduction == "mean":
        return jnp.mean(f)
    if reduction == "sum":
        return jnp.sum(f)
    return f


if __name__ == "__main__":
    key = jax.random.PRNGKey(0)
    ok = True

    def check(got, want, rtol=1e-4, atol=1e-6):
        return (bool(jnp.all(jnp.isfinite(got)))
                and bool(jnp.allclose(got, want, rtol=rtol, atol=atol)))

    # 1) Small ragged case (n not a multiple of 128): lane padding + masked
    #    tail + tiny single-block path; all reductions, default alpha/gamma.
    n = 300
    k1, k2, key = jax.random.split(key, 3)
    logits = jax.random.normal(k1, (n,), jnp.float32)
    labels = jax.random.bernoulli(k2, 0.5, (n,)).astype(jnp.float32)
    for red in ("mean", "sum", "none"):
        got = jax.block_until_ready(
            focal_loss(logits, labels, alpha=0.5, gamma=1.0, reduction=red))
        want = focal_loss_reference(logits, labels, alpha=0.5, gamma=1.0,
                                    reduction=red)
        ok &= check(got, want)

    # 2) Lane-aligned multi-block case (no wrapper copies, 2-way core split on
    #    the reduce path), non-default alpha and integer gamma=2.
    n = 128 * 2048
    k1, k2, key = jax.random.split(key, 3)
    logits = jax.random.normal(k1, (n,), jnp.float32)
    labels = jax.random.bernoulli(k2, 0.3, (n,)).astype(jnp.float32)
    for red in ("mean", "sum"):
        got = jax.block_until_ready(
            focal_loss(logits, labels, alpha=0.25, gamma=2.0, reduction=red))
        want = focal_loss_reference(logits, labels, alpha=0.25, gamma=2.0,
                                    reduction=red)
        ok &= check(got, want)

    # 3) bf16 logits read natively (in-kernel upcast), ragged multi-block,
    #    non-integer gamma exercises the generic pow path.
    n = 128 * 2048 + 37
    k1, k2, key = jax.random.split(key, 3)
    logits = jax.random.normal(k1, (n,), jnp.float32).astype(jnp.bfloat16)
    labels = jax.random.bernoulli(k2, 0.5, (n,)).astype(jnp.float32)
    got = jax.block_until_ready(
        focal_loss(logits, labels, alpha=0.25, gamma=1.5, reduction="mean"))
    want = focal_loss_reference(logits, labels, alpha=0.25, gamma=1.5,
                                reduction="mean")
    ok &= check(got, want, rtol=1e-3)

    assert ok
    print("KERNEL_OK")
</pallas_src>

<mosaic_0001>
module attributes {stable_mosaic.version = 11 : i64} {
  func.func @_focal_reduce_kernel(%arg0: i32, %arg1: i32, %arg2: memref<3x128xf32, #tpu.memory_space<vmem>>, %arg3: memref<3x128xf32, #tpu.memory_space<vmem>>, %arg4: memref<8x128xf32, #tpu.memory_space<vmem>>, %arg5: memref<8x128xf32, #tpu.memory_space<vmem>>) attributes {dimension_semantics = [#tpu.dimension_semantics<parallel>, #tpu.dimension_semantics<arbitrary>], iteration_bounds = array<i64: 2, 1>, scalar_prefetch = 0 : i64, scratch_operands = 1 : i64, tpu.core_type = #tpu.core_type<tc>, window_params = [{transform_indices = @transform_0, window_bounds = array<i64: 3, 128>}, {transform_indices = @transform_1, window_bounds = array<i64: 3, 128>}, {transform_indices = @transform_2, window_bounds = array<i64: 8, 128>}]} {
    %c1_i32 = arith.constant 1 : i32
    %0 = arith.muli %arg0, %c1_i32 : i32
    %1 = arith.addi %0, %arg1 : i32
    %c0_i32 = arith.constant 0 : i32
    %2 = arith.cmpi eq, %arg1, %c0_i32 : i32
    %3 = arith.extui %2 : i1 to i32
    %c0_i32_0 = arith.constant 0 : i32
    %4 = arith.cmpi ne, %3, %c0_i32_0 : i32
    scf.if %4 {
      %cst = arith.constant 0.000000e+00 : f32
      %14 = vector.broadcast %cst : f32 to vector<8x128xf32>
      %c0 = arith.constant 0 : index
      %c0_7 = arith.constant 0 : index
      %15 = vector.load %arg5[%c0, %c0_7] : memref<8x128xf32, #tpu.memory_space<vmem>>, vector<8x128xf32>
      tpu.vector_store %arg5[%c0, %c0_7], %14 {strides = array<i32>} : memref<8x128xf32, #tpu.memory_space<vmem>>, vector<8x128xf32>,
    } else {
    }
    %c0_i32_1 = arith.constant 0 : i32
    %5 = arith.cmpi slt, %1, %c0_i32_1 : i32
    %6 = arith.extui %5 : i1 to i32
    %c0_i32_2 = arith.constant 0 : i32
    %7 = arith.cmpi ne, %6, %c0_i32_2 : i32
    scf.if %7 {
      %c0 = arith.constant 0 : index
      %c0_7 = arith.constant 0 : index
      %14 = vector.load %arg2[%c0, %c0_7] : memref<3x128xf32, #tpu.memory_space<vmem>>, vector<3x128xf32>
      %c0_8 = arith.constant 0 : index
      %c0_9 = arith.constant 0 : index
      %15 = vector.load %arg3[%c0_8, %c0_9] : memref<3x128xf32, #tpu.memory_space<vmem>>, vector<3x128xf32>
      %cst = arith.constant 0.000000e+00 : f32
      %16 = vector.broadcast %cst : f32 to vector<3x128xf32>
      %17 = arith.maximumf %14, %16 : vector<3x128xf32>
      %18 = arith.mulf %14, %15 : vector<3x128xf32>
      %19 = arith.subf %17, %18 : vector<3x128xf32>
      %20 = math.absf %14 : vector<3x128xf32>
      %cst_10 = arith.constant 0.000000e+00 : f32
      %21 = vector.broadcast %cst_10 : f32 to vector<3x128xf32>
      %22 = arith.subf %21, %20 : vector<3x128xf32>
      %23 = math.exp %22 : vector<3x128xf32>
      %cst_11 = arith.constant 1.000000e+00 : f32
      %24 = vector.broadcast %cst_11 : f32 to vector<3x128xf32>
      %25 = arith.addf %24, %23 : vector<3x128xf32>
      %26 = math.log %25 : vector<3x128xf32>
      %27 = arith.addf %19, %26 : vector<3x128xf32>
      %cst_12 = arith.constant 0.000000e+00 : f32
      %28 = vector.broadcast %cst_12 : f32 to vector<3x128xf32>
      %29 = arith.subf %28, %27 : vector<3x128xf32>
      %30 = math.exp %29 : vector<3x128xf32>
      %31 = arith.fptosi %15 : vector<3x128xf32> to vector<3x128xi32>
      %c0_i32_13 = arith.constant 0 : i32
      %32 = vector.broadcast %c0_i32_13 : i32 to vector<3x128xi32>
      %33 = arith.cmpi eq, %31, %32 : vector<3x128xi32>
      %cst_14 = arith.constant 5.000000e-01 : f32
      %cst_15 = arith.constant 5.000000e-01 : f32
      %34 = vector.broadcast %cst_14 : f32 to vector<3x128xf32>
      %35 = vector.broadcast %cst_15 : f32 to vector<3x128xf32>
      %36 = arith.select %33, %34, %35 : vector<3x128xi1>, vector<3x128xf32>
      %cst_16 = arith.constant 1.000000e+00 : f32
      %37 = vector.broadcast %cst_16 : f32 to vector<3x128xf32>
      %38 = arith.subf %37, %30 : vector<3x128xf32>
      %39 = arith.mulf %36, %38 : vector<3x128xf32>
      %40 = arith.mulf %39, %27 : vector<3x128xf32>
      %cst_17 = arith.constant dense<0.000000e+00> : vector<128xf32>
      %41 = vector.multi_reduction <add>, %40, %cst_17 [0] : vector<3x128xf32> to vector<128xf32>
      %42 = vector.shape_cast %41 : vector<128xf32> to vector<1x128xf32>
      %43 = tpu.iota {dimensions = array<i32: 0>} : vector<8x128xi32>
      %c0_i32_18 = arith.constant 0 : i32
      %44 = vector.broadcast %c0_i32_18 : i32 to vector<8x128xi32>
      %45 = arith.cmpi eq, %43, %44 : vector<8x128xi32>
      %c0_19 = arith.constant 0 : index
      %c0_20 = arith.constant 0 : index
      %46 = vector.load %arg5[%c0_19, %c0_20] : memref<8x128xf32, #tpu.memory_space<vmem>>, vector<8x128xf32>
      %cst_21 = arith.constant 0.000000e+00 : f32
      %47 = vector.shape_cast %42 : vector<1x128xf32> to vector<1x128xf32>
      %48 = vector.broadcast %47 : vector<1x128xf32> to vector<8x128xf32>
      %49 = vector.broadcast %cst_21 : f32 to vector<8x128xf32>
      %50 = arith.select %45, %48, %49 : vector<8x128xi1>, vector<8x128xf32>
      %51 = arith.addf %46, %50 : vector<8x128xf32>
      %c0_22 = arith.constant 0 : index
      %c0_23 = arith.constant 0 : index
      %52 = vector.load %arg5[%c0_22, %c0_23] : memref<8x128xf32, #tpu.memory_space<vmem>>, vector<8x128xf32>
      tpu.vector_store %arg5[%c0_22, %c0_23], %51 {strides = array<i32>} : memref<8x128xf32, #tpu.memory_space<vmem>>, vector<8x128xf32>,
    } else {
    }
    %c0_i32_3 = arith.constant 0 : i32
    %8 = arith.cmpi eq, %1, %c0_i32_3 : i32
    %9 = arith.extui %8 : i1 to i32
    %c0_i32_4 = arith.constant 0 : i32
    %10 = arith.cmpi ne, %9, %c0_i32_4 : i32
    scf.if %10 {
      %c0 = arith.constant 0 : index
      %c0_7 = arith.constant 0 : index
      %14 = vector.load %arg2[%c0, %c0_7] : memref<3x128xf32, #tpu.memory_space<vmem>>, vector<3x128xf32>
      %c0_8 = arith.constant 0 : index
      %c0_9 = arith.constant 0 : index
      %15 = vector.load %arg3[%c0_8, %c0_9] : memref<3x128xf32, #tpu.memory_space<vmem>>, vector<3x128xf32>
      %cst = arith.constant 0.000000e+00 : f32
      %16 = vector.broadcast %cst : f32 to vector<3x128xf32>
      %17 = arith.maximumf %14, %16 : vector<3x128xf32>
      %18 = arith.mulf %14, %15 : vector<3x128xf32>
      %19 = arith.subf %17, %18 : vector<3x128xf32>
      %20 = math.absf %14 : vector<3x128xf32>
      %cst_10 = arith.constant 0.000000e+00 : f32
      %21 = vector.broadcast %cst_10 : f32 to vector<3x128xf32>
      %22 = arith.subf %21, %20 : vector<3x128xf32>
      %23 = math.exp %22 : vector<3x128xf32>
      %cst_11 = arith.constant 1.000000e+00 : f32
      %24 = vector.broadcast %cst_11 : f32 to vector<3x128xf32>
      %25 = arith.addf %24, %23 : vector<3x128xf32>
      %26 = math.log %25 : vector<3x128xf32>
      %27 = arith.addf %19, %26 : vector<3x128xf32>
      %cst_12 = arith.constant 0.000000e+00 : f32
      %28 = vector.broadcast %cst_12 : f32 to vector<3x128xf32>
      %29 = arith.subf %28, %27 : vector<3x128xf32>
      %30 = math.exp %29 : vector<3x128xf32>
      %31 = arith.fptosi %15 : vector<3x128xf32> to vector<3x128xi32>
      %c0_i32_13 = arith.constant 0 : i32
      %32 = vector.broadcast %c0_i32_13 : i32 to vector<3x128xi32>
      %33 = arith.cmpi eq, %31, %32 : vector<3x128xi32>
      %cst_14 = arith.constant 5.000000e-01 : f32
      %cst_15 = arith.constant 5.000000e-01 : f32
      %34 = vector.broadcast %cst_14 : f32 to vector<3x128xf32>
      %35 = vector.broadcast %cst_15 : f32 to vector<3x128xf32>
      %36 = arith.select %33, %34, %35 : vector<3x128xi1>, vector<3x128xf32>
      %cst_16 = arith.constant 1.000000e+00 : f32
      %37 = vector.broadcast %cst_16 : f32 to vector<3x128xf32>
      %38 = arith.subf %37, %30 : vector<3x128xf32>
      %39 = arith.mulf %36, %38 : vector<3x128xf32>
      %40 = arith.mulf %39, %27 : vector<3x128xf32>
      %41 = tpu.iota {dimensions = array<i32: 0>} : vector<3x128xi32>
      %42 = tpu.iota {dimensions = array<i32: 1>} : vector<3x128xi32>
      %c128_i32 = arith.constant 128 : i32
      %43 = vector.broadcast %c128_i32 : i32 to vector<3x128xi32>
      %44 = arith.muli %41, %43 : vector<3x128xi32>
      %c0_i32_17 = arith.constant 0 : i32
      %45 = vector.broadcast %c0_i32_17 : i32 to vector<3x128xi32>
      %46 = arith.addi %45, %44 : vector<3x128xi32>
      %47 = arith.addi %46, %42 : vector<3x128xi32>
      %c300_i32 = arith.constant 300 : i32
      %48 = vector.broadcast %c300_i32 : i32 to vector<3x128xi32>
      %49 = arith.cmpi slt, %47, %48 : vector<3x128xi32>
      %cst_18 = arith.constant 0.000000e+00 : f32
      %50 = vector.broadcast %cst_18 : f32 to vector<3x128xf32>
      %51 = arith.select %49, %40, %50 : vector<3x128xi1>, vector<3x128xf32>
      %cst_19 = arith.constant dense<0.000000e+00> : vector<128xf32>
      %52 = vector.multi_reduction <add>, %51, %cst_19 [0] : vector<3x128xf32> to vector<128xf32>
      %53 = vector.shape_cast %52 : vector<128xf32> to vector<1x128xf32>
      %54 = tpu.iota {dimensions = array<i32: 0>} : vector<8x128xi32>
      %c0_i32_20 = arith.constant 0 : i32
      %55 = vector.broadcast %c0_i32_20 : i32 to vector<8x128xi32>
      %56 = arith.cmpi eq, %54, %55 : vector<8x128xi32>
      %c0_21 = arith.constant 0 : index
      %c0_22 = arith.constant 0 : index
      %57 = vector.load %arg5[%c0_21, %c0_22] : memref<8x128xf32, #tpu.memory_space<vmem>>, vector<8x128xf32>
      %cst_23 = arith.constant 0.000000e+00 : f32
      %58 = vector.shape_cast %53 : vector<1x128xf32> to vector<1x128xf32>
      %59 = vector.broadcast %58 : vector<1x128xf32> to vector<8x128xf32>
      %60 = vector.broadcast %cst_23 : f32 to vector<8x128xf32>
      %61 = arith.select %56, %59, %60 : vector<8x128xi1>, vector<8x128xf32>
      %62 = arith.addf %57, %61 : vector<8x128xf32>
      %c0_24 = arith.constant 0 : index
      %c0_25 = arith.constant 0 : index
      %63 = vector.load %arg5[%c0_24, %c0_25] : memref<8x128xf32, #tpu.memory_space<vmem>>, vector<8x128xf32>
      tpu.vector_store %arg5[%c0_24, %c0_25], %62 {strides = array<i32>} : memref<8x128xf32, #tpu.memory_space<vmem>>, vector<8x128xf32>,
    } else {
    }
    %c0_i32_5 = arith.constant 0 : i32
    %11 = arith.cmpi eq, %arg1, %c0_i32_5 : i32
    %12 = arith.extui %11 : i1 to i32
    %c0_i32_6 = arith.constant 0 : i32
    %13 = arith.cmpi ne, %12, %c0_i32_6 : i32
    scf.if %13 {
      %c0 = arith.constant 0 : index
      %c0_7 = arith.constant 0 : index
      %14 = vector.load %arg5[%c0, %c0_7] : memref<8x128xf32, #tpu.memory_space<vmem>>, vector<8x128xf32>
      %cst = arith.constant 0.00333333341 : f32
      %15 = vector.broadcast %cst : f32 to vector<8x128xf32>
      %16 = arith.mulf %14, %15 : vector<8x128xf32>
      %c0_8 = arith.constant 0 : index
      %c0_9 = arith.constant 0 : index
      %17 = vector.load %arg4[%c0_8, %c0_9] : memref<8x128xf32, #tpu.memory_space<vmem>>, vector<8x128xf32>
      tpu.vector_store %arg4[%c0_8, %c0_9], %16 {strides = array<i32>} : memref<8x128xf32, #tpu.memory_space<vmem>>, vector<8x128xf32>,
    } else {
    }
    return
  }
  func.func @transform_0(%arg0: i32, %arg1: i32) -> (i32, i32) {
    %c1_i32 = arith.constant 1 : i32
    %0 = arith.muli %arg0, %c1_i32 : i32
    %1 = arith.addi %0, %arg1 : i32
    %c0_i32 = arith.constant 0 : i32
    %2 = arith.minsi %1, %c0_i32 : i32
    %c0_i32_0 = arith.constant 0 : i32
    %c0_i32_1 = arith.constant 0 : i32
    return %2, %c0_i32_0 : i32, i32
  }
  func.func @transform_1(%arg0: i32, %arg1: i32) -> (i32, i32) {
    %c1_i32 = arith.constant 1 : i32
    %0 = arith.muli %arg0, %c1_i32 : i32
    %1 = arith.addi %0, %arg1 : i32
    %c0_i32 = arith.constant 0 : i32
    %2 = arith.minsi %1, %c0_i32 : i32
    %c0_i32_0 = arith.constant 0 : i32
    %c0_i32_1 = arith.constant 0 : i32
    return %2, %c0_i32_0 : i32, i32
  }
  func.func @transform_2(%arg0: i32, %arg1: i32) -> (i32, i32) {
    %c0_i32 = arith.constant 0 : i32
    %c0_i32_0 = arith.constant 0 : i32
    return %arg0, %c0_i32 : i32, i32
  }
}

</mosaic_0001>

<bundles_post_ra>
// kernel: tpu_custom_call.1
= control target key start
LH: loop header
LB: loop body
LE: loop exit
PB: predicated region body
PF: predicated region fallthrough
CT: control target
= control target key end

     0   :  { %7 = vsyncpa [#allocation4], 0  ;;  %s973_s0 = inlined_call_operand.hbm [shape: f32[3,128], index: 0, kind: input, shape index: {}]   ;;  %s974_s1 = inlined_call_operand.hbm [shape: f32[3,128], index: 1, kind: input, shape index: {}]   ;;  %s975_s2 = inlined_call_operand.hbm [shape: f32[16,128], index: 2, kind: output, shape index: {}]  }
   0x1   :  { %9 = vsyncpa [#allocation4 + $0x1], 0 }
   0x2   :  { %10 = vsyncpa [#allocation7], 0 }
   0x3   :  { %12 = vsyncpa [#allocation7 + $0x1], 0 }
   0x4   :  { %13 = vsyncpa [#allocation5], 0 }
   0x5   :  { %15 = vsyncpa [#allocation5 + $0x1], 0  ;;  %s751_s9 = smov 0   ;;  %s753_s10 = smov 0  }
   0x6   :  { %s755_s11 = smov 0   ;;  %s757_s12 = smov 0  }
   0x7   :  { %s759_s13 = smov 0   ;;  %s761_s14 = smov 0  }
   0x8   :  { %s763_s15 = smov 0   ;;  %s765_s16 = smov 0  }
   0x9 LB: > { %s441_s17 = sadd.s32 4294967295, %s730_s16   ;;  %s442_s18 = sadd.s32 4294967294, %s730_s16   ;;  %s730_s16 = sphi %s765_s16, %s21_s16   ;;  %s726_s15 = sphi %s763_s15, %s996_s15   ;;  %s722_s14 = sphi %s761_s14, %s995_s14   ;;  %s718_s13 = sphi %s759_s13, %s963_s13   ;;  %s714_s12 = sphi %s757_s12, %s994_s12   ;;  %s710_s11 = sphi %s755_s11, %s993_s11   ;;  %s706_s10 = sphi %s753_s10, %s992_s10   ;;  %s702_s9 = sphi %s751_s9, %s991_s9  }
   0xa   : > { %s33_s19 = sadd.s32 1, %s726_s15  ;;  %p699_p1 = scmp.ne.s32.totalorder %s718_s13, 0 }
   0xb   : > { %p35_p0 = scmp.ge.s32.totalorder %s33_s19, 2  ;;  %p54_p2 = scmp.eq.s32.totalorder %s730_s16, 0 }
   0xc   : > { %p59_p3 = scmp.ne.s32.totalorder %s718_s13, %s714_s12  ;;  %p60_p5 = scmp.eq.s32.totalorder %s441_s17, 0 }
   0xd   : > { %s998_s19 = smov (%p35_p0, %s33_s19), 0  ;;  %p797_p4 = por %p699_p1, %p54_p2 }
   0xe   : > { %p801_p6 = por %p60_p5, %p59_p3  ;;  %s101_s22 = ssub.s32 %s726_s15, %s998_s19 }
   0xf   : > { %p102_p7 = scmp.eq.s32.totalorder %s101_s22, 0  ;;  %s104_s23 = sadd.s32 1, %s710_s11 }
  0x10   : > { %s979_s21 = scalar_select %p801_p6, 1, 0 }
  0x11   : > { %s809_s24 = scalar_select %p102_p7, %s710_s11, %s104_s23  }
  0x12   : > { %p114_p8 = scmp.ne.s32.totalorder %s710_s11, %s706_s10  ;;  %p115_p9 = scmp.eq.s32.totalorder %s441_s17, 1 }
  0x13   : > { %p120_p10 = scmp.ne.s32.totalorder %s706_s10, %s702_s9  ;;  %p121_p11 = scmp.eq.s32.totalorder %s442_s18, 1 }
  0x14   : > { %p815_p12 = por %p115_p9, %p114_p8  ;;  %p476_p1 = scmp.lt.s32.totalorder %s730_s16, 2 }
  0x15   : > { %p820_p0 = por %p121_p11, %p120_p10  ;;  %s732_s27 = smov [#allocation3]  }
  0x16   : > { %s980_s25 = scalar_select %p815_p12, 1, 0 }
  0x17   : > { %s981_s26 = scalar_select %p820_p0, 1, 0 }
  0x18   : > { %s155_s28 = sshll.u32 %s732_s27, 4  ;;  %p827_p2 = pnand %p476_p1, %p797_p4  ;;  %s156_s28 = int_to_ptr.vmem [resolvable:$true] %s155_s28 }
  0x19   : > { %s563_s4 = scalar_lea.hbm %s973_s0, 64 }
  0x1a   : > { %p564_p7 = scmp.ne.s32.totalorder %s973_s0, %s563_s4  ;;  %p565_p8 = pneg %p827_p2 }
  0x1b   : > { %p570_p10 = scmp.lt.u32.totalorder %s563_s4, %s563_s4  ;;  %p572_p11 = scmp.lt.u32.totalorder %s563_s4, %s973_s0 }
  0x1c   : > { %p566_p4 = pnand %p565_p8, %p564_p7 }
  0x1d   : > { %p573_p1 = por %p572_p11, %p570_p10 }
  0x1e   : > { %p567_p9 = pneg %p566_p4 }
  0x20   : > { %p574_p13 = pnand %p573_p1, %p567_p9 }
  0x22   : > { %577 = shalt.err (!%p574_p13)
}
  0x23   : > { %s578_s12 = scalar_lea.vmem %s156_s28, 64  ;;  %s585_s17 = scalar_lea.vmem %s156_s28, 128 }
  0x24   : > { %p579_p3 = scmp.ne.s32.totalorder %s156_s28, %s578_s12  ;;  %p586_p12 = scmp.lt.s32.totalorder %s156_s28, %s156_s28 }
  0x25   : > { %p587_p6 = scmp.lt.s32.totalorder %s585_s17, %s578_s12 }
  0x26   : > { %p581_p5 = pnand %p579_p3, %p565_p8 }
  0x27   : > { %p588_p7 = por %p587_p6, %p586_p12 }
  0x28   : > { %p582_p0 = pneg %p581_p5 }
  0x2a   : > { %p589_p4 = pnand %p588_p7, %p582_p0 }
  0x2c   : > { %592 = shalt.err (!%p589_p4)
}
  0x2d   : > { %468 = dma.hbm_to_vmem [thread:$0]  (!%p827_p2), %s973_s0, 64, %s156_s28, [#allocation4]  }
  0x2e   : > { %p983_p13 = scmp.lt.s32.totalorder %s730_s16, 3  ;;  %p984_p9 = scmp.ge.s32.totalorder %s730_s16, 1 }
  0x2f   : > { %s733_s23 = smov [#allocation6]   ;;  %s593_s4 = scalar_lea.hbm %s974_s1, 64 }
  0x30   : > { %p859_p10 = pnand %p984_p9, %p983_p13  ;;  %s176_s27 = sshll.u32 %s733_s23, 4  ;;  %s177_s27 = int_to_ptr.vmem [resolvable:$true] %s176_s27 }
  0x31   : > { %p594_p6 = scmp.ne.s32.totalorder %s974_s1, %s593_s4  ;;  %p600_p3 = scmp.lt.u32.totalorder %s593_s4, %s593_s4 }
  0x32   : > { %s985_s22 = scalar_select %p859_p10, 1, 0 }
  0x33   : > { %p596_p12 = pnand %p594_p6, %p565_p8  ;;  %p602_p5 = scmp.lt.u32.totalorder %s593_s4, %s974_s1 }
  0x35   : > { %p597_p0 = pneg %p596_p12  ;;  %p603_p11 = por %p602_p5, %p600_p3 }
  0x37   : > { %p604_p1 = pnand %p603_p11, %p597_p0 }
  0x39   : > { %607 = shalt.err (!%p604_p1)
}
  0x3a   : > { %s608_s8 = scalar_lea.vmem %s177_s27, 64  ;;  %s615_s12 = scalar_lea.vmem %s177_s27, 128 }
  0x3b   : > { %p609_p7 = scmp.ne.s32.totalorder %s177_s27, %s608_s8  ;;  %p616_p9 = scmp.lt.s32.totalorder %s177_s27, %s177_s27 }
  0x3c   : > { %p617_p10 = scmp.lt.s32.totalorder %s615_s12, %s608_s8 }
  0x3d   : > { %p611_p4 = pnand %p609_p7, %p565_p8 }
  0x3e   : > { %p618_p6 = por %p617_p10, %p616_p9 }
  0x3f   : > { %p612_p13 = pneg %p611_p4 }
  0x41   : > { %p619_p12 = pnand %p618_p6, %p612_p13 }
  0x43   : > { %622 = shalt.err (!%p619_p12)
}
  0x44   : > { %471 = dma.hbm_to_vmem [thread:$0]  (!%p827_p2), %s974_s1, 64, %s177_s27, [#allocation7]  }
  0x45   : > { %p986_p0 = scmp.ne.s32.totalorder %s985_s22, 0 }
  0x46   : > { %s187_s20 = sand.u32 (!%p986_p0), 1, %s718_s13   ;;  %p987_p8 = scmp.ne.s32.totalorder (!%p986_p0), %s979_s21, 0 }
  0x47   : > { %185 = sbr.rel (%p986_p0) target bundleno = 255 (0xff), region = 28  ;;  %s450_s23 = sshll.u32 (!%p986_p0), %s187_s20, 2 }
  0x48   : > { %s188_s30 = scalar_lea.sflag (!%p986_p0), [#allocation4], %s187_s20  ;;  %s886_s3 = scalar_lea.vmem (!%p986_p0), [#allocation3], %s450_s23 }
  0x4e   : > { %688 = dma.done.wait (%p987_p8), %s188_s30, 64  }
  0x4f   : > { %690 = vsyncadd (%p987_p8), %s188_s30, 4294967232  ;;  %s197_s29 = scalar_lea.sflag [#allocation7], %s187_s20  ;;  %s892_s4 = scalar_lea.vmem [#allocation6], %s450_s23 }
  0x50   : > { %692 = dma.done.wait (%p987_p8), %s197_s29, 64  }
  0x51   : > { %694 = vsyncadd (%p987_p8), %s197_s29, 4294967232  ;;  %s223_s22 = sand.u32 1, %s706_s10   ;;  %v734_v0 = vmov 0.0   ;;  %p453_p2 = scmp.ge.s32.totalorder %s722_s14, 0 }
  0x52   : > { %s901_s27 = sshll.u32 %s223_s22, 3  ;;  %237 = vst [vmem:[#allocation2] sm:$0xff] %v734_v0  ;;  %v242_v1 = vld [vmem:[%s886_s3] sm:$0x7] (!%p453_p2)  ;;  %v243_v7 = vld [vmem:[%s892_s4] sm:$0x7] (!%p453_p2)  ;;  %v269_v22 = vlaneseq (!%p453_p2) }
  0x53   : > { %s225_s5 = scalar_lea.vmem [#allocation8], %s901_s27  ;;  %241 = sbr.rel (%p453_p2) target bundleno = 155 (0x9b), region = 44  ;;  %v247_v2 = vand.u32 (!%p453_p2), 2147483647, %v242_v1  ;;  %v244_v8 = vmax.f32 (!%p453_p2), %v242_v1, 0.0  ;;  %v245_v9 = vmul.f32 (!%p453_p2), %v243_v7, %v242_v1  ;;  %vm261_vm0 = vcmask (!%p453_p2), 1042432  }
  0x54   : > { %v270_v25 = vshrl.u32 (!%p453_p2), %v269_v22, 7 }
  0x55   : > { %v248_v3 = vsub.f32 (!%p453_p2), 0.0, %v247_v2  ;;  %v246_v10 = vsub.f32 (!%p453_p2), %v244_v8, %v245_v9 }
  0x56   : > { %vm271_vm1 = vcmp.eq.s32.totalorder (!%p453_p2), %v270_v25, 0 }
  0x57   : > { %v249_v4 = vmul.f32 (!%p453_p2), 1.442695, %v248_v3 }
  0x59   : > { %551 = vpow2.f32 (!%p453_p2), %v249_v4  ;;  %v272_v29 = vld [vmem:[#allocation2] sm:$0xff] (!%p453_p2) }
  0x63   : > { %v552_v5 = vpop.eup %551 }
  0x64   : > { %v251_v6 = vadd.f32 1.0, %v552_v5 }
  0x66   : > { %553 = vlog2.f32 %v251_v6 }
  0x70   : > { %v554_v11 = vpop.eup %553 }
  0x71   : > { %v253_v12 = vmul.f32 0.6931472, %v554_v11 }
  0x73   : > { %v254_v13 = vadd.f32 %v253_v12, %v246_v10 }
  0x75   : > { %v255_v14 = vsub.f32 0.0, %v254_v13 }
  0x77   : > { %v256_v15 = vmul.f32 1.442695, %v255_v14 }
  0x79   : > { %555 = vpow2.f32 %v256_v15 }
  0x83   : > { %v556_v16 = vpop.eup %555 }
  0x84   : > { %v258_v17 = vsub.f32 1.0, %v556_v16 }
  0x86   : > { %v259_v18 = vmul.f32 0.5, %v258_v17 }
  0x88   : > { %v260_v19 = vmul.f32 %v259_v18, %v254_v13 }
  0x8a   : > { %v262_v20 = vsel %vm261_vm0, %v260_v19, 0.0 }
  0x8b   : > { %v263_v21 = vrot.slane %v262_v20, 4 }
  0x8d   : > { %v264_v23 = vadd.f32 %v263_v21, %v262_v20 }
  0x8f   : > { %v265_v24 = vrot.slane %v264_v23, 2 }
  0x91   : > { %v266_v26 = vadd.f32 %v265_v24, %v264_v23 }
  0x93   : > { %v267_v27 = vrot.slane %v266_v26, 1 }
  0x95   : > { %v268_v28 = vadd.f32 %v267_v27, %v266_v26 }
  0x97   : > { %v273_v30 = vsel %vm271_vm1, %v268_v28, 0.0 }
  0x98   : > { %v274_v31 = vadd.f32 %v273_v30, %v272_v29 }
  0x9a   : > { %275 = vst [vmem:[#allocation2] sm:$0xff] %v274_v31 }
  0x9b PF: > { %p454_p10 = scmp.ne.s32.totalorder %s722_s14, 0 }
  0x9c   : > { %v280_v32 = vld [vmem:[%s886_s3] sm:$0x7] (!%p454_p10)  ;;  %v281_v38 = vld [vmem:[%s892_s4] sm:$0x7] (!%p454_p10)  ;;  %v299_v47 = vlaneseq (!%p454_p10)  ;;  %vm307_vm3 = vcmask (!%p454_p10), 1042432  }
  0x9d   : > { %279 = sbr.rel (%p454_p10) target bundleno = 230 (0xe6), region = 48  ;;  %v285_v33 = vand.u32 (!%p454_p10), 2147483647, %v280_v32  ;;  %v282_v39 = vmax.f32 (!%p454_p10), %v280_v32, 0.0  ;;  %v283_v40 = vmul.f32 (!%p454_p10), %v281_v38, %v280_v32 }
  0x9e   : > { %v300_v48 = vshrl.u32 (!%p454_p10), %v299_v47, 7  ;;  %v302_v49 = vand.u32 (!%p454_p10), 127, %v299_v47 }
  0x9f   : > { %v286_v34 = vsub.f32 (!%p454_p10), 0.0, %v285_v33  ;;  %v284_v41 = vsub.f32 (!%p454_p10), %v282_v39, %v283_v40 }
  0xa0   : > { %v303_v50 = vmul.u32 (!%p454_p10), 128, %v300_v48  ;;  %vm315_vm4 = vcmp.eq.s32.totalorder (!%p454_p10), %v300_v48, 0 }
  0xa1   : > { %v287_v35 = vmul.f32 (!%p454_p10), 1.442695, %v286_v34  ;;  %v316_v0 = vld [vmem:[#allocation2] sm:$0xff] (!%p454_p10) }
  0xa2   : > { %v304_v52 = vadd.s32 (!%p454_p10), %v303_v50, %v302_v49 }
  0xa3   : > { %557 = vpow2.f32 (!%p454_p10), %v287_v35 }
  0xa4   : > { %vm305_vm2 = vcmp.lt.s32.totalorder %v304_v52, 300 }
  0xad   : > { %v558_v36 = vpop.eup %557 }
  0xae   : > { %v289_v37 = vadd.f32 1.0, %v558_v36 }
  0xb0   : > { %559 = vlog2.f32 %v289_v37 }
  0xba   : > { %v560_v42 = vpop.eup %559 }
  0xbb   : > { %v291_v43 = vmul.f32 0.6931472, %v560_v42 }
  0xbd   : > { %v292_v44 = vadd.f32 %v291_v43, %v284_v41 }
  0xbf   : > { %v293_v45 = vsub.f32 0.0, %v292_v44 }
  0xc1   : > { %v294_v46 = vmul.f32 1.442695, %v293_v45 }
  0xc3   : > { %561 = vpow2.f32 %v294_v46 }
  0xcd   : > { %v562_v51 = vpop.eup %561 }
  0xce   : > { %v296_v53 = vsub.f32 1.0, %v562_v51 }
  0xd0   : > { %v297_v54 = vmul.f32 0.5, %v296_v53 }
  0xd2   : > { %v298_v55 = vmul.f32 %v297_v54, %v292_v44 }
  0xd4   : > { %v306_v56 = vsel %vm305_vm2, %v298_v55, 0.0 }
  0xd5   : > { %v308_v57 = vsel %vm307_vm3, %v306_v56, 0.0 }
  0xd6   : > { %v309_v58 = vrot.slane %v308_v57, 4 }
  0xd8   : > { %v310_v59 = vadd.f32 %v309_v58, %v308_v57 }
  0xda   : > { %v311_v60 = vrot.slane %v310_v59, 2 }
  0xdc   : > { %v312_v61 = vadd.f32 %v311_v60, %v310_v59 }
  0xde   : > { %v313_v62 = vrot.slane %v312_v61, 1 }
  0xe0   : > { %v314_v63 = vadd.f32 %v313_v62, %v312_v61 }
  0xe2   : > { %v317_v1 = vsel %vm315_vm4, %v314_v63, 0.0 }
  0xe3   : > { %v318_v2 = vadd.f32 %v317_v1, %v316_v0 }
  0xe5   : > { %319 = vst [vmem:[#allocation2] sm:$0xff] %v318_v2 }
  0xe6 PF: > { %s456_s21 = sshll.u32 %s722_s14, 7  ;;  %s340_s8 = sshll.u32 %s225_s5, 4  ;;  %s918_s8 = int_to_ptr.vmem [resolvable:$true] %s340_s8 }
  0xe7   : > { %s914_s7 = scalar_lea.hbm %s975_s2, %s456_s21  ;;  %s327_s12 = scalar_lea.sflag [#allocation5], %s223_s22 }
  0xe8   : > { %s623_s17 = scalar_lea.vmem %s918_s8, 128  ;;  %p988_p5 = scmp.ne.s32.totalorder %s980_s25, 0 }
  0xe9   : > { %p624_p3 = scmp.ne.s32.totalorder %s918_s8, %s623_s17  ;;  %s735_s14 = smov [#allocation8]  }
  0xea   : > { %s627_s18 = sshll.u32 %s735_s14, 4  ;;  %s628_s18 = int_to_ptr.vmem [resolvable:$false] %s627_s18 }
  0xeb   : > { %p625_p11 = pnand %p624_p3, %p988_p5  ;;  %s629_s20 = scalar_lea.vmem %s628_s18, 256 }
  0xec   : > { %v323_v3 = vld [vmem:[#allocation2] sm:$0xff]  ;;  %p630_p7 = scmp.lt.s32.totalorder %s918_s8, %s628_s18  ;;  %p631_p4 = scmp.lt.s32.totalorder %s629_s20, %s623_s17 }
  0xed   : > { %v324_v4 = vmul.f32 0.0033333334, %v323_v3  ;;  %p626_p1 = pneg %p625_p11 }
  0xee   : > { %p632_p13 = por %p631_p4, %p630_p7 }
  0xef   : > { %325 = vst [vmem:[%s225_s5] sm:$0xff] %v324_v4 }
  0xf0   : > { %p633_p9 = pnand %p632_p13, %p626_p1 }
  0xf2   : > { %636 = shalt.err (!%p633_p9)
}
  0xf3   : > { %s637_s23 = scalar_lea.hbm %s914_s7, 128  ;;  %s641_s29 = scalar_lea.hbm %s975_s2, 256 }
  0xf4   : > { %p638_p6 = scmp.ne.s32.totalorder %s914_s7, %s637_s23  ;;  %p642_p8 = scmp.lt.u32.totalorder %s914_s7, %s975_s2 }
  0xf5   : > { %p643_p2 = scmp.lt.u32.totalorder %s641_s29, %s637_s23  ;;  %p645_p3 = scmp.lt.u32.totalorder %s637_s23, %s914_s7 }
  0xf6   : > { %p639_p12 = pnand %p638_p6, %p988_p5 }
  0xf7   : > { %p644_p10 = por %p643_p2, %p642_p8 }
  0xf8   : > { %p640_p0 = pneg %p639_p12 }
  0xf9   : > { %p646_p11 = por %p645_p3, %p644_p10 }
  0xfb   : > { %p647_p1 = pnand %p646_p11, %p640_p0 }
  0xfd   : > { %650 = shalt.err (!%p647_p1)
}
  0xfe   : > { %463 = dma.vmem_to_hbm [thread:$0]  (%p988_p5), %s918_s8, 128, %s914_s7, %s327_s12  }
  0xff PF: > { %s352_s27 = sand.u32 1, %s702_s9   ;;  %p989_p7 = scmp.ne.s32.totalorder %s981_s26, 0 }
 0x100   : > { %p990_p4 = scmp.ge.s32.totalorder %s730_s16, 2  ;;  %s353_s5 = scalar_lea.sflag [#allocation5], %s352_s27 }
 0x102   : > { %p473_p13 = pnand %p990_p4, %p989_p7 }
 0x104   : > { %696 = dma.done.wait (!%p473_p13), %s353_s5, 128  }
 0x105   : > { %698 = vsyncadd (!%p473_p13), %s353_s5, 4294967168  ;;  %s21_s16 = sadd.s32 1, %s730_s16   ;;  %s991_s9 = smov %s706_s10 }
 0x106   : > { %p18_p9 = scmp.ge.s32.totalorder %s21_s16, 4   ;;  %s992_s10 = smov %s710_s11 }
 0x107   : > { %s993_s11 = smov %s809_s24  ;;  %s994_s12 = smov %s718_s13 }
 0x108   : > { %s963_s13 = smov 0   ;;  %s995_s14 = smov %s726_s15 }
 0x109   : > { %s996_s15 = smov %s998_s19  ;;  %20 = sbr.rel (!%p18_p9) target bundleno = 9 (0x9), region = 102 }
 0x110   :  { %358 = vsyncpa [#allocation4], 1 }
 0x111   :  { %360 = vsyncpa [#allocation4 + $0x1], 1 }
 0x112   :  { %361 = vsyncpa [#allocation7], 1 }
 0x113   :  { %363 = vsyncpa [#allocation7 + $0x1], 1 }
 0x114   :  { %364 = vsyncpa [#allocation5], 1 }
 0x115   :  { %366 = vsyncpa [#allocation5 + $0x1], 1 }

</bundles_post_ra>
